<compile_context>
chip_gen: v7x
topology: tpu7x:2x2x1
jax: 0.10.0
libtpu: 0.0.40
codegen_flags: <defaults>
</compile_context>

<pallas_src>
import functools

import jax
import jax.numpy as jnp
from jax.experimental import pallas as pl
from jax.experimental.pallas import tpu as pltpu

_INV_SQRT2 = 0.7071067811865476  # PyTorch nn.GELU default = exact erf
_SUBLANE = 8
_LANE = 128


def _round_up(x, m):
    return ((x + m - 1) // m) * m


def _gelu_exact(x):
    return 0.5 * x * (1.0 + jax.lax.erf(x * _INV_SQRT2))


def mlp_kernel(x_ref, w1_ref, b1_ref, w2_ref, b2_ref, w3_ref, b3_ref, o_ref,
               *, approx_gelu):
    # exact erf GELU matches nn.GELU(); tanh variant uses the EUP slot (v7x).
    act = (lambda v: jax.nn.gelu(v, approximate=True)) if approx_gelu else _gelu_exact

    # x streamed from HBM as f32; cast to bf16 in-kernel (no extra HBM pass).
    x = x_ref[...].astype(jnp.bfloat16)                               # (TM, D_in)
    h1 = jnp.dot(x, w1_ref[...], preferred_element_type=jnp.float32) + b1_ref[...]
    h1 = act(h1)
    h2 = jnp.dot(h1.astype(jnp.bfloat16), w2_ref[...],
                 preferred_element_type=jnp.float32) + b2_ref[...]
    h2 = act(h2)
    y = jnp.dot(h2.astype(jnp.bfloat16), w3_ref[...],
                preferred_element_type=jnp.float32) + b3_ref[...]
    o_ref[...] = y.astype(o_ref.dtype)                                # (TM, out_pad) lane-dense


def _choose_tm(B, d_in, out_pad, resident_bytes):
    """Pick the batch-tile rows per grid step.

    HBM-bound kernel -> big tiles.  Bounded by v5e's 16 MiB default scoped
    VMEM (double-buffered f32 x tile + f32 out tile + resident weights).
    Prefers tiles that cover B exactly (avoid an HBM pad pass on x) and keeps
    >= 2 grid steps for large B so the "parallel" axis shards across v7x's
    two TensorCores.
    """
    budget = 13 * 1024 * 1024 - resident_bytes
    per_row = 2 * 4 * (d_in + out_pad)            # 2 pipeline buffers, f32
    cap = max(_SUBLANE, min(1024, budget // per_row))
    cap = (cap // 256) * 256 if cap >= 256 else (cap // _SUBLANE) * _SUBLANE

    if B <= cap:
        # Whole batch fits in one tile.  Split into two exact halves when the
        # batch is large enough and splits cleanly (dual-TC on v7x); otherwise
        # one full-extent tile (legal even when B % 8 != 0, so no pad needed).
        if B >= 512 and B % (2 * _SUBLANE) == 0:
            return B // 2
        return B

    # Streamed case (grid >= 2 steps): pick the smallest step count at the cap,
    # then shrink the tile to just cover B -> pad is at most a few rows.
    steps = pl.cdiv(B, cap)
    return _round_up(pl.cdiv(B, steps), _SUBLANE)


@functools.partial(jax.jit, static_argnames=("approximate_gelu",))
def mlp_forward(x_nchw, params, *, approximate_gelu=False):
    """x_nchw: (B, C, H, W) float32.  params: dict of W1,b1,W2,b2,W3,b3 (f32)."""
    B = x_nchw.shape[0]
    x2d = x_nchw.reshape(B, -1)                    # b (c h w); stays f32 in HBM
    D_in = x2d.shape[1]

    W1 = params["W1"].astype(jnp.bfloat16)
    W2 = params["W2"].astype(jnp.bfloat16)
    W3 = params["W3"].astype(jnp.bfloat16)
    b1, b2, b3 = params["b1"], params["b2"], params["b3"]
    out_dim = W3.shape[1]

    # Lane-dense output: zero-pad fc3 columns up to a multiple of 128
    # (avoids masked vst.msk partial stores; padded columns sliced off below).
    out_pad = _LANE * pl.cdiv(out_dim, _LANE)
    if out_pad != out_dim:
        W3 = jnp.pad(W3, ((0, 0), (0, out_pad - out_dim)))
        b3 = jnp.pad(b3, ((0, 0), (0, out_pad - out_dim)))

    # Resident (constant index_map) operands; pipeline still allocates 2 bufs.
    resident_bytes = 2 * sum(
        int(a.size) * a.dtype.itemsize for a in (W1, b1, W2, b2, W3, b3))

    TM = _choose_tm(B, D_in, out_pad, resident_bytes)
    B_pad = pl.cdiv(B, TM) * TM
    if B_pad != B:
        # TODO(synk): a masked ragged-tail store would avoid this extra HBM
        # copy; only hit when no tile covers B exactly (pad is a few rows).
        x2d = jnp.pad(x2d, ((0, B_pad - B), (0, 0)))

    grid = (B_pad // TM,)
    resident = lambda a: pl.BlockSpec(a.shape, lambda i: (0,) * a.ndim)

    y = pl.pallas_call(
        functools.partial(mlp_kernel, approx_gelu=approximate_gelu),
        out_shape=jax.ShapeDtypeStruct((B_pad, out_pad), jnp.float32),
        grid=grid,
        in_specs=[
            pl.BlockSpec((TM, D_in), lambda i: (i, 0)),   # streamed f32 x tile
            resident(W1), resident(b1),                   # weights/biases stay in VMEM
            resident(W2), resident(b2),
            resident(W3), resident(b3),
        ],
        out_specs=pl.BlockSpec((TM, out_pad), lambda i: (i, 0)),
        compiler_params=pltpu.CompilerParams(
            dimension_semantics=("parallel",),            # megacore / dual-TC shard
        ),
    )(x2d, W1, b1, W2, b2, W3, b3)

    if B_pad != B or out_pad != out_dim:
        y = y[:B, :out_dim]
    return y


def init_params(key, input_size, hidden_sizes, output_size):
    """Deterministic init matching nn.Linear shapes (stored transposed: (in, out))."""
    k1, k2, k3, k4, k5, k6 = jax.random.split(key, 6)

    def lin(kw, kb, fan_in, fan_out):
        bound = 1.0 / jnp.sqrt(fan_in)
        W = jax.random.uniform(kw, (fan_in, fan_out), jnp.float32, -bound, bound)
        b = jax.random.uniform(kb, (1, fan_out), jnp.float32, -bound, bound)
        return W, b

    W1, b1 = lin(k1, k2, input_size, hidden_sizes)
    W2, b2 = lin(k3, k4, hidden_sizes, hidden_sizes)
    W3, b3 = lin(k5, k6, hidden_sizes, output_size)
    return {"W1": W1, "b1": b1, "W2": W2, "b2": b2, "W3": W3, "b3": b3}


if __name__ == "__main__":
    key = jax.random.PRNGKey(0)
    kx, kp = jax.random.split(key)

    B, C, H, W = 2, 4, 16, 16
    input_size = C * H * W          # 1024
    hidden_sizes = 128
    output_size = 32
    dropout_rate = 0.1              # identity in eval mode

    x = jax.random.normal(kx, (B, C, H, W), jnp.float32)
    params = init_params(kp, input_size, hidden_sizes, output_size)

    y = mlp_forward(x, params)
    jax.block_until_ready(y)

    # Pure-JAX reference mirroring the kernel's mixed precision
    # (bf16 operands, f32 accumulation, f32 biases, exact-erf GELU).
    xr = x.reshape(B, -1).astype(jnp.bfloat16)
    W1b = params["W1"].astype(jnp.bfloat16)
    W2b = params["W2"].astype(jnp.bfloat16)
    W3b = params["W3"].astype(jnp.bfloat16)
    h1 = jnp.dot(xr, W1b, preferred_element_type=jnp.float32) + params["b1"]
    h1 = jax.nn.gelu(h1, approximate=False)
    h2 = jnp.dot(h1.astype(jnp.bfloat16), W2b, preferred_element_type=jnp.float32) + params["b2"]
    h2 = jax.nn.gelu(h2, approximate=False)
    ref = jnp.dot(h2.astype(jnp.bfloat16), W3b, preferred_element_type=jnp.float32) + params["b3"]

    assert y.shape == (B, output_size)
    assert jnp.allclose(y, ref, atol=2e-2, rtol=2e-2)

    print("KERNEL_OK")
</pallas_src>

<mosaic_0001>
module attributes {stable_mosaic.version = 11 : i64} {
  func.func @mlp_kernel(%arg0: i32, %arg1: memref<2x1024xf32, #tpu.memory_space<vmem>>, %arg2: memref<1024x128xbf16, #tpu.memory_space<vmem>>, %arg3: memref<1x128xf32, #tpu.memory_space<vmem>>, %arg4: memref<128x128xbf16, #tpu.memory_space<vmem>>, %arg5: memref<1x128xf32, #tpu.memory_space<vmem>>, %arg6: memref<128x128xbf16, #tpu.memory_space<vmem>>, %arg7: memref<1x128xf32, #tpu.memory_space<vmem>>, %arg8: memref<2x128xf32, #tpu.memory_space<vmem>>) attributes {dimension_semantics = [#tpu.dimension_semantics<parallel>], iteration_bounds = array<i64: 1>, scalar_prefetch = 0 : i64, scratch_operands = 0 : i64, tpu.core_type = #tpu.core_type<tc>, window_params = [{transform_indices = @transform_0, window_bounds = array<i64: 2, 1024>}, {pipeline_mode = #tpu.pipeline_mode<synchronous>, transform_indices = @transform_1, window_bounds = array<i64: 1024, 128>}, {pipeline_mode = #tpu.pipeline_mode<synchronous>, transform_indices = @transform_2, window_bounds = array<i64: 1, 128>}, {pipeline_mode = #tpu.pipeline_mode<synchronous>, transform_indices = @transform_3, window_bounds = array<i64: 128, 128>}, {pipeline_mode = #tpu.pipeline_mode<synchronous>, transform_indices = @transform_4, window_bounds = array<i64: 1, 128>}, {pipeline_mode = #tpu.pipeline_mode<synchronous>, transform_indices = @transform_5, window_bounds = array<i64: 128, 128>}, {pipeline_mode = #tpu.pipeline_mode<synchronous>, transform_indices = @transform_6, window_bounds = array<i64: 1, 128>}, {transform_indices = @transform_7, window_bounds = array<i64: 2, 128>}]} {
    %c0 = arith.constant 0 : index
    %c0_0 = arith.constant 0 : index
    %0 = vector.load %arg1[%c0, %c0_0] : memref<2x1024xf32, #tpu.memory_space<vmem>>, vector<2x1024xf32>
    %1 = arith.truncf %0 : vector<2x1024xf32> to vector<2x1024xbf16>
    %c0_1 = arith.constant 0 : index
    %c0_2 = arith.constant 0 : index
    %2 = vector.load %arg2[%c0_1, %c0_2] : memref<1024x128xbf16, #tpu.memory_space<vmem>>, vector<1024x128xbf16>
    %cst = arith.constant dense<0.000000e+00> : vector<2x128xf32>
    %3 = tpu.matmul %1, %2, %cst {dimension_numbers = #tpu.dot_dimension_numbers<[1], [0], [0], [1], [0, 0, 1, 1], [], []>} : vector<2x1024xbf16>, vector<1024x128xbf16>, vector<2x128xf32> -> vector<2x128xf32>
    %c0_3 = arith.constant 0 : index
    %c0_4 = arith.constant 0 : index
    %4 = vector.load %arg3[%c0_3, %c0_4] : memref<1x128xf32, #tpu.memory_space<vmem>>, vector<1x128xf32>
    %5 = vector.broadcast %4 : vector<1x128xf32> to vector<2x128xf32>
    %6 = arith.addf %3, %5 : vector<2x128xf32>
    %cst_5 = arith.constant 5.000000e-01 : f32
    %7 = vector.broadcast %cst_5 : f32 to vector<2x128xf32>
    %8 = arith.mulf %7, %6 : vector<2x128xf32>
    %cst_6 = arith.constant 0.707106769 : f32
    %9 = vector.broadcast %cst_6 : f32 to vector<2x128xf32>
    %10 = arith.mulf %6, %9 : vector<2x128xf32>
    %11 = math.erf %10 : vector<2x128xf32>
    %cst_7 = arith.constant 1.000000e+00 : f32
    %12 = vector.broadcast %cst_7 : f32 to vector<2x128xf32>
    %13 = arith.addf %12, %11 : vector<2x128xf32>
    %14 = arith.mulf %8, %13 : vector<2x128xf32>
    %15 = arith.truncf %14 : vector<2x128xf32> to vector<2x128xbf16>
    %c0_8 = arith.constant 0 : index
    %c0_9 = arith.constant 0 : index
    %16 = vector.load %arg4[%c0_8, %c0_9] : memref<128x128xbf16, #tpu.memory_space<vmem>>, vector<128x128xbf16>
    %cst_10 = arith.constant dense<0.000000e+00> : vector<2x128xf32>
    %17 = tpu.matmul %15, %16, %cst_10 {dimension_numbers = #tpu.dot_dimension_numbers<[1], [0], [0], [1], [0, 0, 1, 1], [], []>} : vector<2x128xbf16>, vector<128x128xbf16>, vector<2x128xf32> -> vector<2x128xf32>
    %c0_11 = arith.constant 0 : index
    %c0_12 = arith.constant 0 : index
    %18 = vector.load %arg5[%c0_11, %c0_12] : memref<1x128xf32, #tpu.memory_space<vmem>>, vector<1x128xf32>
    %19 = vector.broadcast %18 : vector<1x128xf32> to vector<2x128xf32>
    %20 = arith.addf %17, %19 : vector<2x128xf32>
    %cst_13 = arith.constant 5.000000e-01 : f32
    %21 = vector.broadcast %cst_13 : f32 to vector<2x128xf32>
    %22 = arith.mulf %21, %20 : vector<2x128xf32>
    %cst_14 = arith.constant 0.707106769 : f32
    %23 = vector.broadcast %cst_14 : f32 to vector<2x128xf32>
    %24 = arith.mulf %20, %23 : vector<2x128xf32>
    %25 = math.erf %24 : vector<2x128xf32>
    %cst_15 = arith.constant 1.000000e+00 : f32
    %26 = vector.broadcast %cst_15 : f32 to vector<2x128xf32>
    %27 = arith.addf %26, %25 : vector<2x128xf32>
    %28 = arith.mulf %22, %27 : vector<2x128xf32>
    %29 = arith.truncf %28 : vector<2x128xf32> to vector<2x128xbf16>
    %c0_16 = arith.constant 0 : index
    %c0_17 = arith.constant 0 : index
    %30 = vector.load %arg6[%c0_16, %c0_17] : memref<128x128xbf16, #tpu.memory_space<vmem>>, vector<128x128xbf16>
    %cst_18 = arith.constant dense<0.000000e+00> : vector<2x128xf32>
    %31 = tpu.matmul %29, %30, %cst_18 {dimension_numbers = #tpu.dot_dimension_numbers<[1], [0], [0], [1], [0, 0, 1, 1], [], []>} : vector<2x128xbf16>, vector<128x128xbf16>, vector<2x128xf32> -> vector<2x128xf32>
    %c0_19 = arith.constant 0 : index
    %c0_20 = arith.constant 0 : index
    %32 = vector.load %arg7[%c0_19, %c0_20] : memref<1x128xf32, #tpu.memory_space<vmem>>, vector<1x128xf32>
    %33 = vector.broadcast %32 : vector<1x128xf32> to vector<2x128xf32>
    %34 = arith.addf %31, %33 : vector<2x128xf32>
    %c0_21 = arith.constant 0 : index
    %c0_22 = arith.constant 0 : index
    %35 = vector.load %arg8[%c0_21, %c0_22] : memref<2x128xf32, #tpu.memory_space<vmem>>, vector<2x128xf32>
    tpu.vector_store %arg8[%c0_21, %c0_22], %34 {strides = array<i32>} : memref<2x128xf32, #tpu.memory_space<vmem>>, vector<2x128xf32>,
    return
  }
  func.func @transform_0(%arg0: i32) -> (i32, i32) {
    %c0_i32 = arith.constant 0 : i32
    %c0_i32_0 = arith.constant 0 : i32
    return %arg0, %c0_i32 : i32, i32
  }
  func.func @transform_1(%arg0: i32) -> (i32, i32) {
    %c0_i32 = arith.constant 0 : i32
    %c0_i32_0 = arith.constant 0 : i32
    %c0_i32_1 = arith.constant 0 : i32
    return %c0_i32, %c0_i32_0 : i32, i32
  }
  func.func @transform_2(%arg0: i32) -> (i32, i32) {
    %c0_i32 = arith.constant 0 : i32
    %c0_i32_0 = arith.constant 0 : i32
    %c0_i32_1 = arith.constant 0 : i32
    return %c0_i32, %c0_i32_0 : i32, i32
  }
  func.func @transform_3(%arg0: i32) -> (i32, i32) {
    %c0_i32 = arith.constant 0 : i32
    %c0_i32_0 = arith.constant 0 : i32
    %c0_i32_1 = arith.constant 0 : i32
    return %c0_i32, %c0_i32_0 : i32, i32
  }
  func.func @transform_4(%arg0: i32) -> (i32, i32) {
    %c0_i32 = arith.constant 0 : i32
    %c0_i32_0 = arith.constant 0 : i32
    %c0_i32_1 = arith.constant 0 : i32
    return %c0_i32, %c0_i32_0 : i32, i32
  }
  func.func @transform_5(%arg0: i32) -> (i32, i32) {
    %c0_i32 = arith.constant 0 : i32
    %c0_i32_0 = arith.constant 0 : i32
    %c0_i32_1 = arith.constant 0 : i32
    return %c0_i32, %c0_i32_0 : i32, i32
  }
  func.func @transform_6(%arg0: i32) -> (i32, i32) {
    %c0_i32 = arith.constant 0 : i32
    %c0_i32_0 = arith.constant 0 : i32
    %c0_i32_1 = arith.constant 0 : i32
    return %c0_i32, %c0_i32_0 : i32, i32
  }
  func.func @transform_7(%arg0: i32) -> (i32, i32) {
    %c0_i32 = arith.constant 0 : i32
    %c0_i32_0 = arith.constant 0 : i32
    return %arg0, %c0_i32 : i32, i32
  }
}

</mosaic_0001>

<bundles_post_ra>
// kernel: mlp_forward.1
= control target key start
LH: loop header
LB: loop body
LE: loop exit
PB: predicated region body
PF: predicated region fallthrough
CT: control target
= control target key end

     0   :  { %v36_v28 = vlaneseq  ;;  %v1353_v36 = vmov 1983009808   ;;  %s1688_s0 = inlined_call_operand.vmem [shape: f32[2,1024], index: 0, kind: input, shape index: {}]   ;;  %s1689_s1 = inlined_call_operand.vmem [shape: bf16[1024,128], index: 1, kind: input, shape index: {}]   ;;  %s1690_s2 = inlined_call_operand.vmem [shape: f32[1,128], index: 2, kind: input, shape index: {}]   ;;  %s1691_s3 = inlined_call_operand.vmem [shape: bf16[128,128], index: 3, kind: input, shape index: {}]   ;;  %s1692_s4 = inlined_call_operand.vmem [shape: f32[1,128], index: 4, kind: input, shape index: {}]   ;;  %s1693_s5 = inlined_call_operand.vmem [shape: bf16[128,128], index: 5, kind: input, shape index: {}]   ;;  %s1694_s6 = inlined_call_operand.vmem [shape: f32[1,128], index: 6, kind: input, shape index: {}]   ;;  %s1695_s7 = inlined_call_operand.hbm [shape: f32[2,128], index: 7, kind: output, shape index: {}]  }
   0x1   :  { %v1243_v0 = vld [vmem:[%s1689_s1 + $0x40] sm:$0xff]   ;;  %v1247_v4 = vld [vmem:[%s1689_s1 + $0x48] sm:$0xff]   ;;  %v1251_v8 = vld [vmem:[%s1689_s1 + $0x50] sm:$0xff]   ;;  %v34_v37 = vunpack.c.l.s4 %v1353_v36 }
   0x2   :  { %v1244_v1 = vld [vmem:[%s1689_s1 + $0xc0] sm:$0xff]   ;;  %1093 = vmatprep.subr.bf16.mxu0 %v1243_v0  ;;  %v1248_v5 = vld [vmem:[%s1689_s1 + $0xc8] sm:$0xff]   ;;  %v1252_v9 = vld [vmem:[%s1689_s1 + $0xd0] sm:$0xff]   ;;  %v37_v33 = vshrl.u32 %v36_v28, 7 }
   0x3   :  { %v1245_v2 = vld [vmem:[%s1689_s1] sm:$0xff]   ;;  %1115 = vmatprep.subr.bf16.mxu1 %v1244_v1  ;;  %v1249_v6 = vld [vmem:[%s1689_s1 + $0x8] sm:$0xff]   ;;  %v1253_v10 = vld [vmem:[%s1689_s1 + $0x10] sm:$0xff]   ;;  %v35_v39 = vunpack.c.0.s8 %v34_v37 }
   0x4   :  { %v1246_v3 = vld [vmem:[%s1689_s1 + $0x80] sm:$0xff]   ;;  %1094 = vmatpush3.bf16.msra.mxu0 %v1245_v2  ;;  %v1250_v7 = vld [vmem:[%s1689_s1 + $0x88] sm:$0xff]   ;;  %v1254_v11 = vld [vmem:[%s1689_s1 + $0x90] sm:$0xff]  }
   0x5   :  { %1116 = vmatpush3.bf16.msra.mxu1 %v1246_v3  ;;  %1095 = vmatprep.subr.bf16.mxu0 %v1247_v4  ;;  %v1255_v12 = vld [vmem:[%s1689_s1 + $0x58] sm:$0xff]   ;;  %v1259_v16 = vld [vmem:[%s1689_s1 + $0x60] sm:$0xff]   ;;  %v1263_v20 = vld [vmem:[%s1689_s1 + $0x68] sm:$0xff]   ;;  %v1502_v41 = vsub.s32 %v35_v39, %v37_v33 }
   0x6   :  { %1117 = vmatprep.subr.bf16.mxu1 %v1248_v5  ;;  %v1256_v13 = vld [vmem:[%s1689_s1 + $0xd8] sm:$0xff]   ;;  %v1260_v17 = vld [vmem:[%s1689_s1 + $0xe0] sm:$0xff]   ;;  %v1264_v21 = vld [vmem:[%s1689_s1 + $0xe8] sm:$0xff]  }
   0x7   :  { %v1257_v14 = vld [vmem:[%s1689_s1 + $0x18] sm:$0xff]   ;;  %v1261_v18 = vld [vmem:[%s1689_s1 + $0x20] sm:$0xff]   ;;  %v1265_v22 = vld [vmem:[%s1689_s1 + $0x28] sm:$0xff]  }
   0x8   :  { %1096 = vmatpush3.bf16.msra.mxu0 %v1249_v6  ;;  %v1258_v15 = vld [vmem:[%s1689_s1 + $0x98] sm:$0xff]   ;;  %v1262_v19 = vld [vmem:[%s1689_s1 + $0xa0] sm:$0xff]   ;;  %v1266_v23 = vld [vmem:[%s1689_s1 + $0xa8] sm:$0xff]  }
   0x9   :  { %1118 = vmatpush3.bf16.msra.mxu1 %v1250_v7  ;;  %1097 = vmatprep.subr.bf16.mxu0 %v1251_v8  ;;  %v1267_v24 = vld [vmem:[%s1689_s1 + $0x70] sm:$0xff]   ;;  %v1271_v29 = vld [vmem:[%s1689_s1 + $0x78] sm:$0xff]   ;;  %v28_v34 = vld [vmem:[%s1688_s0] sm:$0xff] }
   0xa   :  { %1119 = vmatprep.subr.bf16.mxu1 %v1252_v9  ;;  %v1268_v25 = vld [vmem:[%s1689_s1 + $0xf0] sm:$0xff]   ;;  %v1272_v30 = vld [vmem:[%s1689_s1 + $0xf8] sm:$0xff]   ;;  %v1276_v35 = vld [vmem:[%s1689_s1 + $0x140] sm:$0xff]   ;;  %v32_v40 = vcombine.high %v28_v34, %v28_v34  ;;  %v39_v42 = vrot.slane %v28_v34, %v1502_v41 }
   0xb   :  { %v1269_v26 = vld [vmem:[%s1689_s1 + $0x30] sm:$0xff]   ;;  %v1273_v31 = vld [vmem:[%s1689_s1 + $0x38] sm:$0xff]   ;;  %v1277_v38 = vld [vmem:[%s1689_s1 + $0x1c0] sm:$0xff]  }
   0xc   :  { %1098 = vmatpush3.bf16.msra.mxu0 %v1253_v10  ;;  %v1270_v27 = vld [vmem:[%s1689_s1 + $0xb0] sm:$0xff]   ;;  %v1274_v32 = vld [vmem:[%s1689_s1 + $0xb8] sm:$0xff]   ;;  %v46_v43 = vrot.slane %v32_v40, %v1502_v41  ;;  %v47_v44 = vcombine.high %v39_v42, %v39_v42  ;;  %v1278_v46 = vld [vmem:[%s1689_s1 + $0x100] sm:$0xff]   ;;  %v74_v47 = vpack.c.bf16 %v39_v42, %v39_v42 }
   0xd   :  { %1120 = vmatpush3.bf16.msra.mxu1 %v1254_v11  ;;  %1099 = vmatprep.subr.bf16.mxu0 %v1255_v12  ;;  %v1279_v49 = vld [vmem:[%s1689_s1 + $0x180] sm:$0xff]   ;;  %v1280_v52 = vld [vmem:[%s1689_s1 + $0x148] sm:$0xff]   ;;  %v1284_v56 = vld [vmem:[%s1689_s1 + $0x150] sm:$0xff]  }
   0xe   :  { %1121 = vmatprep.subr.bf16.mxu1 %v1256_v13  ;;  %v48_v45 = vcombine.high %v46_v43, %v46_v43  ;;  %v76_v48 = vpack.c.bf16 %v46_v43, %v46_v43  ;;  %v75_v50 = vpack.c.bf16 %v47_v44, %v47_v44  ;;  %v1281_v53 = vld [vmem:[%s1689_s1 + $0x1c8] sm:$0xff]   ;;  %v1285_v57 = vld [vmem:[%s1689_s1 + $0x1d0] sm:$0xff]   ;;  %v1288_v60 = vld [vmem:[%s1689_s1 + $0x158] sm:$0xff]  }
   0xf   :  { %v1282_v54 = vld [vmem:[%s1689_s1 + $0x108] sm:$0xff]   ;;  %v1286_v58 = vld [vmem:[%s1689_s1 + $0x110] sm:$0xff]   ;;  %v1289_v61 = vld [vmem:[%s1689_s1 + $0x1d8] sm:$0xff]  }
  0x10   :  { %1100 = vmatpush3.bf16.msra.mxu0 %v1257_v14  ;;  %v77_v51 = vpack.c.bf16 %v48_v45, %v48_v45  ;;  %633 = vmatprep.mubr.bf16.mxu0 %v75_v50  ;;  %v1283_v55 = vld [vmem:[%s1689_s1 + $0x188] sm:$0xff]   ;;  %v1287_v59 = vld [vmem:[%s1689_s1 + $0x190] sm:$0xff]   ;;  %v1290_v62 = vld [vmem:[%s1689_s1 + $0x118] sm:$0xff]  }
  0x11   :  { %1122 = vmatpush3.bf16.msra.mxu1 %v1258_v15  ;;  %1101 = vmatprep.subr.bf16.mxu0 %v1259_v16  ;;  %v1291_v63 = vld [vmem:[%s1689_s1 + $0x198] sm:$0xff]   ;;  %v1292_v0 = vld [vmem:[%s1689_s1 + $0x160] sm:$0xff]   ;;  %v1296_v4 = vld [vmem:[%s1689_s1 + $0x168] sm:$0xff]  }
  0x12   :  { %1123 = vmatprep.subr.bf16.mxu1 %v1260_v17  ;;  %673 = vmatprep.mubr.bf16.mxu1 %v77_v51  ;;  %v1293_v1 = vld [vmem:[%s1689_s1 + $0x1e0] sm:$0xff]   ;;  %v1297_v5 = vld [vmem:[%s1689_s1 + $0x1e8] sm:$0xff]   ;;  %v1300_v8 = vld [vmem:[%s1689_s1 + $0x170] sm:$0xff]  }
  0x13   :  { %v1294_v2 = vld [vmem:[%s1689_s1 + $0x120] sm:$0xff]   ;;  %v1298_v6 = vld [vmem:[%s1689_s1 + $0x128] sm:$0xff]   ;;  %v1301_v9 = vld [vmem:[%s1689_s1 + $0x1f0] sm:$0xff]  }
  0x14   :  { %1102 = vmatpush3.bf16.msra.mxu0 %v1261_v18  ;;  %v1295_v3 = vld [vmem:[%s1689_s1 + $0x1a0] sm:$0xff]   ;;  %v1299_v7 = vld [vmem:[%s1689_s1 + $0x1a8] sm:$0xff]   ;;  %v1302_v11 = vld [vmem:[%s1689_s1 + $0x130] sm:$0xff]  }
  0x15   :  { %1124 = vmatpush3.bf16.msra.mxu1 %v1262_v19  ;;  %1103 = vmatprep.subr.bf16.mxu0 %v1263_v20  ;;  %v29_v10 = vld [vmem:[%s1688_s0 + $0x8] sm:$0xff]  ;;  %v1303_v12 = vld [vmem:[%s1689_s1 + $0x1b0] sm:$0xff]   ;;  %v1304_v15 = vld [vmem:[%s1689_s1 + $0x178] sm:$0xff]  }
  0x16   :  { %1125 = vmatprep.subr.bf16.mxu1 %v1264_v21  ;;  %v56_v13 = vrot.slane %v29_v10, %v1502_v41  ;;  %v49_v14 = vcombine.high %v29_v10, %v29_v10  ;;  %v1305_v16 = vld [vmem:[%s1689_s1 + $0x1f8] sm:$0xff]  }
  0x17   :  { %v1306_v19 = vld [vmem:[%s1689_s1 + $0x138] sm:$0xff]  }
  0x18   :  { %1104 = vmatpush3.bf16.msra.mxu0 %v1265_v22  ;;  %v64_v17 = vcombine.high %v56_v13, %v56_v13  ;;  %v63_v18 = vrot.slane %v49_v14, %v1502_v41  ;;  %v1307_v20 = vld [vmem:[%s1689_s1 + $0x1b8] sm:$0xff]  }
  0x19   :  { %1126 = vmatpush3.bf16.msra.mxu1 %v1266_v23  ;;  %1105 = vmatprep.subr.bf16.mxu0 %v1267_v24  ;;  %v78_v24 = vpack.c.bf16 %v56_v13, %v56_v13 }
  0x1a   :  { %1127 = vmatprep.subr.bf16.mxu1 %v1268_v25  ;;  %v79_v21 = vpack.c.bf16 %v64_v17, %v64_v17  ;;  %v65_v22 = vcombine.high %v63_v18, %v63_v18  ;;  %v80_v25 = vpack.c.bf16 %v63_v18, %v63_v18 }
  0x1c   :  { %1106 = vmatpush3.bf16.msra.mxu0 %v1269_v26  ;;  %v81_v23 = vpack.c.bf16 %v65_v22, %v65_v22 }
  0x1d   :  { %1128 = vmatpush3.bf16.msra.mxu1 %v1270_v27  ;;  %1107 = vmatprep.subr.bf16.mxu0 %v1271_v29 }
  0x1e   :  { %1129 = vmatprep.subr.bf16.mxu1 %v1272_v30 }
  0x20   :  { %1108 = vmatpush3.bf16.msra.mxu0 %v1273_v31 }
  0x21   :  { %1130 = vmatpush3.bf16.msra.mxu1 %v1274_v32  ;;  %1137 = vmatprep.subr.bf16.mxu0 %v1276_v35 }
  0x22   :  { %1159 = vmatprep.subr.bf16.mxu1 %v1277_v38 }
  0x23   :  { %634 = vmatmul.mubr.bf16.vlgmr.msra.gmra.mrb[0].mxu0 %v74_v47 }
  0x24   :  { %674 = vmatmul.mubr.bf16.vlgmr.msra.gmra.mrb[0].mxu1 %v76_v48  ;;  %1138 = vmatpush3.bf16.msra.mxu0 %v1278_v46 }
  0x25   :  { %1160 = vmatpush3.bf16.msra.mxu1 %v1279_v49  ;;  %1139 = vmatprep.subr.bf16.mxu0 %v1280_v52 }
  0x26   :  { %1161 = vmatprep.subr.bf16.mxu1 %v1281_v53  ;;  %713 = vmatprep.mubr.bf16.mxu0 %v79_v21 }
  0x27   :  { %753 = vmatprep.mubr.bf16.mxu1 %v81_v23 }
  0x28   :  { %1140 = vmatpush3.bf16.msra.mxu0 %v1282_v54 }
  0x29   :  { %1162 = vmatpush3.bf16.msra.mxu1 %v1283_v55  ;;  %1141 = vmatprep.subr.bf16.mxu0 %v1284_v56 }
  0x2a   :  { %1163 = vmatprep.subr.bf16.mxu1 %v1285_v57 }
  0x2c   :  { %1142 = vmatpush3.bf16.msra.mxu0 %v1286_v58 }
  0x2d   :  { %1164 = vmatpush3.bf16.msra.mxu1 %v1287_v59  ;;  %1143 = vmatprep.subr.bf16.mxu0 %v1288_v60 }
  0x2e   :  { %1165 = vmatprep.subr.bf16.mxu1 %v1289_v61 }
  0x30   :  { %1144 = vmatpush3.bf16.msra.mxu0 %v1290_v62 }
  0x31   :  { %1166 = vmatpush3.bf16.msra.mxu1 %v1291_v63  ;;  %1145 = vmatprep.subr.bf16.mxu0 %v1292_v0 }
  0x32   :  { %1167 = vmatprep.subr.bf16.mxu1 %v1293_v1 }
  0x34   :  { %1146 = vmatpush3.bf16.msra.mxu0 %v1294_v2 }
  0x35   :  { %1168 = vmatpush3.bf16.msra.mxu1 %v1295_v3  ;;  %1147 = vmatprep.subr.bf16.mxu0 %v1296_v4 }
  0x36   :  { %1169 = vmatprep.subr.bf16.mxu1 %v1297_v5 }
  0x38   :  { %1148 = vmatpush3.bf16.msra.mxu0 %v1298_v6 }
  0x39   :  { %1170 = vmatpush3.bf16.msra.mxu1 %v1299_v7  ;;  %1149 = vmatprep.subr.bf16.mxu0 %v1300_v8 }
  0x3a   :  { %1171 = vmatprep.subr.bf16.mxu1 %v1301_v9 }
  0x3c   :  { %1150 = vmatpush3.bf16.msra.mxu0 %v1302_v11 }
  0x3d   :  { %1172 = vmatpush3.bf16.msra.mxu1 %v1303_v12  ;;  %1151 = vmatprep.subr.bf16.mxu0 %v1304_v15 }
  0x3e   :  { %1173 = vmatprep.subr.bf16.mxu1 %v1305_v16 }
  0x40   :  { %1152 = vmatpush3.bf16.msra.mxu0 %v1306_v19 }
  0x41   :  { %1174 = vmatpush3.bf16.msra.mxu1 %v1307_v20 }
  0x42   :  { %12 = vsyncpa [#allocation3], 0  ;;  %v1309_v26 = vld [vmem:[%s1691_s3] sm:$0xff]   ;;  %v1354_v27 = vmov 0.0   ;;  %v1310_v28 = vld [vmem:[%s1691_s3 + $0x8] sm:$0xff]   ;;  %vm1355_vm0 = vmmov 0  }
  0x43   :  { %714 = vmatmul.mubr.bf16.vlgmr.msra.gmra.mrb[4].mxu0 %v78_v24  ;;  %1199 = vmatprep.subr.bf16.mxu0 %v1354_v27  ;;  %v1311_v29 = vld [vmem:[%s1691_s3 + $0x10] sm:$0xff]   ;;  %v1312_v30 = vld [vmem:[%s1691_s3 + $0x18] sm:$0xff]   ;;  %v1313_v31 = vld [vmem:[%s1691_s3 + $0x20] sm:$0xff]   ;;  %s1356_s26 = smov [#allocation2]  }
  0x44   :  { %754 = vmatmul.mubr.bf16.vlgmr.msra.gmra.mrb[4].mxu1 %v80_v25  ;;  %1219 = vmatprep.subr.bf16.mxu1 %v1354_v27  ;;  %v1314_v32 = vld [vmem:[%s1691_s3 + $0x28] sm:$0xff]   ;;  %v1315_v33 = vld [vmem:[%s1691_s3 + $0x30] sm:$0xff]   ;;  %v1316_v34 = vld [vmem:[%s1691_s3 + $0x38] sm:$0xff]   ;;  %s1002_s27 = sshll.u32 %s1356_s26, 4  ;;  %s1003_s27 = int_to_ptr.vmem [resolvable:$true] %s1002_s27 }
  0x45   :  { %1200 = vmatpush3.bf16.msra.mxu0 %v1309_v26  ;;  %1215 = vmatprep.mubr.msk.bf16.mxu0 %vm1355_vm0, %v1354_v27  ;;  %v1317_v35 = vld [vmem:[%s1693_s5] sm:$0xff]   ;;  %v1318_v36 = vld [vmem:[%s1693_s5 + $0x8] sm:$0xff]   ;;  %v1319_v37 = vld [vmem:[%s1693_s5 + $0x10] sm:$0xff]   ;;  %p1334_p1 = scmp.lt.s32.totalorder %s1003_s27, %s1003_s27 }
  0x46   :  { %1201 = vmatprep.subr.bf16.mxu0 %v1354_v27  ;;  %1235 = vmatprep.mubr.msk.bf16.mxu1 %vm1355_vm0, %v1354_v27  ;;  %v1010_v40 = vld [vmem:[%s1690_s2] ss:$0 sm:$0xff]  ;;  %v1320_v5 = vld [vmem:[%s1693_s5 + $0x18] sm:$0xff]   ;;  %v1322_v7 = vld [vmem:[%s1693_s5 + $0x28] sm:$0xff]  }
  0x47   :  { %1220 = vmatpush3.bf16.msra.mxu1 %v1317_v35  ;;  %v1321_v6 = vld [vmem:[%s1693_s5 + $0x20] sm:$0xff]   ;;  %v1323_v8 = vld [vmem:[%s1693_s5 + $0x30] sm:$0xff]   ;;  %v1324_v9 = vld [vmem:[%s1693_s5 + $0x38] sm:$0xff]  }
  0x48   :  { %1221 = vmatprep.subr.bf16.mxu1 %v1354_v27  ;;  %v1075_v10 = vld [vmem:[%s1692_s4] ss:$0 sm:$0xff]  ;;  %s1329_s4 = scalar_lea.vmem %s1003_s27, 32 }
  0x49   :  { %1202 = vmatpush3.bf16.msra.mxu0 %v1310_v28  ;;  %v1084_v22 = vld [vmem:[%s1694_s6] ss:$0 sm:$0xff]  ;;  %p1330_p0 = scmp.ne.s32.totalorder %s1003_s27, %s1329_s4  ;;  %p1335_p2 = scmp.lt.s32.totalorder %s1329_s4, %s1329_s4 }
  0x4a   :  { %1203 = vmatprep.subr.bf16.mxu0 %v1354_v27 }
  0x4b   :  { %1222 = vmatpush3.bf16.msra.mxu1 %v1318_v36  ;;  %p1336_p3 = por %p1335_p2, %p1334_p1 }
  0x4c   :  { %1223 = vmatprep.subr.bf16.mxu1 %v1354_v27 }
  0x4d   :  { %1204 = vmatpush3.bf16.msra.mxu0 %v1311_v29  ;;  %p1337_p4 = pnand %p1336_p3, %p1330_p0 }
  0x4e   :  { %1205 = vmatprep.subr.bf16.mxu0 %v1354_v27 }
  0x4f   :  { %1224 = vmatpush3.bf16.msra.mxu1 %v1319_v37 }
  0x50   :  { %1225 = vmatprep.subr.bf16.mxu1 %v1354_v27 }
  0x51   :  { %1206 = vmatpush3.bf16.msra.mxu0 %v1312_v30 }
  0x52   :  { %1207 = vmatprep.subr.bf16.mxu0 %v1354_v27 }
  0x53   :  { %1226 = vmatpush3.bf16.msra.mxu1 %v1320_v5 }
  0x54   :  { %1227 = vmatprep.subr.bf16.mxu1 %v1354_v27 }
  0x55   :  { %1208 = vmatpush3.bf16.msra.mxu0 %v1313_v31 }
  0x56   :  { %1209 = vmatprep.subr.bf16.mxu0 %v1354_v27 }
  0x57   :  { %1228 = vmatpush3.bf16.msra.mxu1 %v1321_v6 }
  0x58   :  { %1229 = vmatprep.subr.bf16.mxu1 %v1354_v27 }
  0x59   :  { %1210 = vmatpush3.bf16.msra.mxu0 %v1314_v32 }
  0x5a   :  { %1211 = vmatprep.subr.bf16.mxu0 %v1354_v27 }
  0x5b   :  { %1230 = vmatpush3.bf16.msra.mxu1 %v1322_v7 }
  0x5c   :  { %1231 = vmatprep.subr.bf16.mxu1 %v1354_v27 }
  0x5d   :  { %1212 = vmatpush3.bf16.msra.mxu0 %v1315_v33 }
  0x5e   :  { %1213 = vmatprep.subr.bf16.mxu0 %v1354_v27 }
  0x5f   :  { %1232 = vmatpush3.bf16.msra.mxu1 %v1323_v8 }
  0x60   :  { %1233 = vmatprep.subr.bf16.mxu1 %v1354_v27 }
  0x61   :  { %1214 = vmatpush3.bf16.msra.mxu0 %v1316_v34 }
  0x63   :  { %1234 = vmatpush3.bf16.msra.mxu1 %v1324_v9 }
  0xf6   :  { %v1109_v38 = vpop.f32.mrb[0].mxu0 }
  0xf7   :  { %v1131_v39 = vpop.f32.mrb[0].mxu1  ;;  %v1110_v41 = vpop.f32.mrb[1].mxu0 }
  0xf8   :  { %v1132_v42 = vpop.f32.mrb[1].mxu1  ;;  %v1111_v43 = vadd.f32 %v1110_v41, %v1109_v38  ;;  %v1112_v45 = vpop.f32.mrb[2].mxu0 }
  0xf9   :  { %v1133_v44 = vadd.f32 %v1132_v42, %v1131_v39  ;;  %v1134_v46 = vpop.f32.mrb[2].mxu1  ;;  %v1113_v47 = vpop.f32.mrb[3].mxu0 }
  0xfa   :  { %v1135_v48 = vpop.f32.mrb[3].mxu1  ;;  %v636_v49 = vadd.f32 %v1111_v43, %v1010_v40 }
  0xfc   :  { %v676_v50 = vadd.f32 %v1133_v44, %v636_v49 }
 0x116   :  { %v1153_v51 = vpop.f32.mrb[4].mxu0 }
 0x117   :  { %v1175_v52 = vpop.f32.mrb[4].mxu1  ;;  %v1154_v53 = vpop.f32.mrb[5].mxu0 }
 0x118   :  { %v1176_v54 = vpop.f32.mrb[5].mxu1  ;;  %v1155_v55 = vadd.f32 %v1154_v53, %v1153_v51  ;;  %v1156_v57 = vpop.f32.mrb[6].mxu0 }
 0x119   :  { %v1177_v56 = vadd.f32 %v1176_v54, %v1175_v52  ;;  %v1178_v58 = vpop.f32.mrb[6].mxu1  ;;  %v1157_v59 = vpop.f32.mrb[7].mxu0 }
 0x11a   :  { %v1179_v60 = vpop.f32.mrb[7].mxu1  ;;  %v716_v61 = vadd.f32 %v1155_v55, %v676_v50 }
 0x11c   :  { %v756_v62 = vadd.f32 %v1177_v56, %v716_v61 }
 0x11e   :  { %v762_v63 = vmul.f32 0.70710677, %v756_v62  ;;  %v761_v1 = vmul.f32 0.5, %v756_v62 }
 0x120   :  { %1325 = verf.f32 %v762_v63 }
 0x12a   :  { %v1326_v0 = vpop.eup %1325 }
 0x12b   :  { %v764_v2 = vadd.f32 1.0, %v1326_v0 }
 0x12d   :  { %v765_v3 = vmul.f32 %v764_v2, %v761_v1 }
 0x12f   :  { %v766_v4 = vpack.c.bf16 %v765_v3, %v765_v3 }
 0x131   :  { %1216 = vmatmul.mubr.bf16.vlgmr.msra.gmra.mrb[8].mxu0 %v766_v4 }
 0x204   :  { %v872_v11 = vpop.f32.mrb[8].mxu0 }
 0x205   :  { %v873_v12 = vadd.f32 %v1075_v10, %v872_v11  ;;  %v1217_v13 = vpop.f32.mrb[9].mxu0 }
 0x206   :  { %v875_v14 = vpop.f32.mrb[10].mxu0 }
 0x207   :  { %v879_v15 = vmul.f32 0.70710677, %v873_v12  ;;  %v1218_v16 = vpop.f32.mrb[11].mxu0  ;;  %v878_v18 = vmul.f32 0.5, %v873_v12 }
 0x209   :  { %1327 = verf.f32 %v879_v15 }
 0x213   :  { %v1328_v17 = vpop.eup %1327 }
 0x214   :  { %v881_v19 = vadd.f32 1.0, %v1328_v17 }
 0x216   :  { %v882_v20 = vmul.f32 %v881_v19, %v878_v18 }
 0x218   :  { %v883_v21 = vpack.c.bf16 %v882_v20, %v882_v20 }
 0x21a   :  { %1236 = vmatmul.mubr.bf16.vlgmr.msra.gmra.mrb[8].mxu1 %v883_v21 }
 0x2ed   :  { %v989_v23 = vpop.f32.mrb[8].mxu1 }
 0x2ee   :  { %v990_v24 = vadd.f32 %v1084_v22, %v989_v23  ;;  %v1237_v25 = vpop.f32.mrb[9].mxu1 }
 0x2ef   :  { %v992_v26 = vpop.f32.mrb[10].mxu1 }
 0x2f0   :  { %995 = vst [vmem:[#allocation2] sm:$0x3] %v990_v24  ;;  %v1238_v27 = vpop.f32.mrb[11].mxu1 }
 0x2f1   :  { %1340 = shalt.err (!%p1337_p4)
}
 0x2f2   :  { %s1341_s6 = scalar_lea.hbm %s1695_s7, 32 }
 0x2f3   :  { %p1342_p5 = scmp.ne.s32.totalorder %s1695_s7, %s1341_s6  ;;  %p1345_p6 = scmp.lt.u32.totalorder %s1341_s6, %s1695_s7 }
 0x2f5   :  { %p1347_p7 = pnand %p1345_p6, %p1342_p5 }
 0x2f7   :  { %1350 = shalt.err (!%p1347_p7)
}
 0x2f8   :  { %1005 = dma.vmem_to_hbm [thread:$0]  %s1003_s27, 32, %s1695_s7, [#allocation3]  }
 0x2f9   :  { %1351 = dma.done.wait [#allocation3], 32  }
 0x2fa   :  { %1352 = vsyncadd [#allocation3], 4294967264 }
 0x2fb   :  { %1009 = vsyncpa [#allocation3], 1 }

</bundles_post_ra>
